<compile_context>
chip_gen: v7x
topology: tpu7x:2x2x1
jax: 0.10.0
libtpu: 0.0.40
codegen_flags: <defaults>
</compile_context>

<pallas_src>
import jax
import jax.numpy as jnp
from jax.experimental import pallas as pl
from jax.experimental.pallas import tpu as pltpu


def _round_up(x, m):
    return ((x + m - 1) // m) * m


def _device_caps():
    """Gen-specific batch-tile cap, VMEM limit and elementwise dtype."""
    try:
        kind = jax.devices()[0].device_kind.lower()
    except Exception:  # pragma: no cover - defensive
        kind = ""
    is_v7 = "v7" in kind
    is_v5 = "v5" in kind
    tm_cap = 16384 if is_v7 else 32768          # v7x: 64 MiB VMEM -> smaller cap
    vmem_limit = (48 if is_v7 else 96) << 20    # leave physical headroom
    ew_dtype = jnp.float32 if is_v5 else jnp.bfloat16  # v5e VALU has no bf16
    return tm_cap, vmem_limit, ew_dtype


# ----------------------------- Pallas kernel --------------------------------
def _make_mlp_kernel(vocab_sizes, k_pad, ew_dtype):
    """Kernel for a fixed ordered tuple of categorical vocab sizes."""
    vocab_sizes = tuple(vocab_sizes)

    def kernel(xnum_ref, ids_ref, w1_ref, b1_ref, w2_ref, b2_ref,
               w3c_ref, b3_ref, o_ref):
        n_num, tm = xnum_ref.shape

        # ---- Build the fused layer-1 operand [k_pad, TM]:
        #      rows [0, n_num) numerics, then one one-hot block per categorical
        #      feature, then zero padding.  Built in f32 (native 32-bit sublane
        #      layout for the unaligned concat) then cast once to bf16.
        parts = [xnum_ref[...].astype(jnp.float32)]
        for c, v in enumerate(vocab_sizes):
            idx = ids_ref[c:c + 1, :]                              # [1, TM] int32
            iota = jax.lax.broadcasted_iota(jnp.int32, (v, tm), 0)
            # OOB ids -> all-zero column (torch would raise); see header note.
            parts.append((iota == idx).astype(jnp.float32))        # [v, TM]
        pad = k_pad - n_num - sum(vocab_sizes)
        if pad:
            parts.append(jnp.zeros((pad, tm), jnp.float32))
        x_full = jnp.concatenate(parts, axis=0).astype(jnp.bfloat16)  # [k_pad,TM]

        # ---- Layer 1: single K=k_pad MXU dot, f32 accumulation, then
        #      bias + ReLU in ew_dtype (bf16 on v6e/v7x, f32 on v5e).
        acc = jnp.dot(w1_ref[...], x_full,
                      preferred_element_type=jnp.float32)          # [H1, TM] f32
        h1 = jnp.maximum(acc.astype(ew_dtype) + b1_ref[...], 0)

        # ---- Layer 2: Linear + ReLU (f32 bias/ReLU -- only [H2, TM]).
        acc2 = jnp.dot(w2_ref[...], h1.astype(jnp.bfloat16),
                       preferred_element_type=jnp.float32)         # [H2, TM] f32
        h2 = jnp.maximum(acc2 + b2_ref[...], 0.0)

        # ---- Output layer on VPU + XLU: z = sum_k w3[k] * h2[k, :] + b3.
        #      No MXU 1-row matmul, no bf16 cast of h2, exact sigmoid.
        z = jnp.sum(h2 * w3c_ref[...], axis=0, keepdims=True) + b3_ref[...]
        o_ref[...] = 1.0 / (1.0 + jnp.exp(-z))                     # [1, TM] f32

    return kernel


# ------------------------------- Wrapper -------------------------------------
def mlp_forward(x_num_t, ids_t, params, vocab_sizes, *, tm=None):
    """x_num_t: [n_num, batch] bf16, ids_t: [n_cat, batch] int32.

    params = (w1_full [H1, k_pad] bf16  (cols: [numeric | cat_0 | cat_1 | 0pad]),
              b1 [H1,1] f32, w2 [H2,H1] bf16, b2 [H2,1] f32,
              w3_col [H2,1] f32, b3 [1,1] f32)
    Returns sigmoid output of shape [batch, 1] (float32).
    """
    w1_full, b1, w2, b2, w3c, b3 = params
    n_num, batch = x_num_t.shape
    n_cat = ids_t.shape[0]
    h1, h2 = w2.shape[1], w3c.shape[0]
    k_pad = w1_full.shape[1]
    assert k_pad >= n_num + sum(vocab_sizes)

    # Scalability guard: the fused in-register one-hot costs O(V*TM) VPU
    # compares + a K=V MXU contraction per categorical feature.  Fine for tiny
    # vocabs; for large vocabs switch to a gathered-embedding formulation.
    # TODO(synk): large-vocab path (scalar-prefetch ids + pl.Element/DMA row
    # gather of W1 columns) instead of one-hot matmul.
    if vocab_sizes:
        assert max(vocab_sizes) <= 2048, "fused one-hot path is for small vocabs"

    tm_cap, vmem_limit, ew_dtype = _device_caps()

    # ---- Batch tiling: large tile (amortizes ~0.35us grid-step overhead),
    #      gen-specific cap, multiple of 128, and >= 2 grid steps when the
    #      batch allows it so both v7x TensorCores get work.
    b128 = _round_up(batch, 128)
    tm_eff = tm if tm is not None else tm_cap
    tm_eff = min(tm_eff, tm_cap, b128)
    if b128 >= 256:
        tm_eff = min(tm_eff, max(128, (b128 // 2) // 128 * 128))
    tm_eff = max(128, (tm_eff // 128) * 128)
    padded = _round_up(batch, tm_eff)

    if padded != batch:
        # Padded columns produce garbage outputs sliced off below (benign).
        x_num_t = jnp.pad(x_num_t, ((0, 0), (0, padded - batch)))
        ids_t = jnp.pad(ids_t, ((0, 0), (0, padded - batch)))

    b1_ew = b1.astype(ew_dtype)
    weight_args = [w1_full, b1_ew, w2, b2, w3c, b3]
    # Constant index_map -> weights fetched once and kept VMEM-resident.
    resident = lambda a: pl.BlockSpec(a.shape, lambda i: (0, 0))

    cost = pl.CostEstimate(
        flops=2 * padded * (k_pad * h1 + h1 * h2 + h2 * 1),
        transcendentals=padded,
        bytes_accessed=(x_num_t.size * x_num_t.dtype.itemsize
                        + ids_t.size * 4
                        + padded * 4
                        + sum(a.size * a.dtype.itemsize for a in weight_args)),
    )

    out = pl.pallas_call(
        _make_mlp_kernel(tuple(vocab_sizes), k_pad, ew_dtype),
        out_shape=jax.ShapeDtypeStruct((1, padded), jnp.float32),
        grid=(padded // tm_eff,),
        in_specs=[pl.BlockSpec((n_num, tm_eff), lambda i: (0, i)),
                  pl.BlockSpec((n_cat, tm_eff), lambda i: (0, i))]
                 + [resident(a) for a in weight_args],
        out_specs=pl.BlockSpec((1, tm_eff), lambda i: (0, i)),
        compiler_params=pltpu.CompilerParams(
            dimension_semantics=("parallel",),
            vmem_limit_bytes=vmem_limit),
        cost_estimate=cost,
    )(x_num_t, ids_t, *weight_args)

    return out[0, :batch].reshape(batch, 1)


# ----------------------------- Glue (plain JAX) -------------------------------
def preprocessing(x_dict, numeric_feature_names, categorical_feature_names):
    """Feature-major preprocessing: no one-hot materialization, no concat of a
    [batch, input_size] matrix -- only raw numerics (bf16) and int32 ids."""
    x_num_t = jnp.stack(
        [x_dict[n].astype(jnp.float32) for n in numeric_feature_names], axis=0
    ).astype(jnp.bfloat16)                                   # [n_num, batch]
    ids_t = jnp.stack(
        [x_dict[c].reshape(-1).astype(jnp.int32)
         for c in categorical_feature_names], axis=0)        # [n_cat, batch]
    return x_num_t, ids_t


def init_params(key, n_num, vocab_sizes, hidden_units, out_dim=1):
    """PyTorch nn.Linear-style uniform fan-in init, kept in [out, in] layout.
    Layer-1 weight columns ordered [numeric | cat_0 | cat_1 | ... | zero-pad],
    matching the implied _preprocessing concat order and the fused kernel."""
    input_size = n_num + sum(vocab_sizes)
    k_pad = _round_up(input_size, 16)                        # bf16 sublane tile
    dims = [input_size] + list(hidden_units) + [out_dim]
    raw = []
    for i in range(len(dims) - 1):
        key, kw, kb = jax.random.split(key, 3)
        bound = 1.0 / float(dims[i]) ** 0.5
        w = jax.random.uniform(kw, (dims[i + 1], dims[i]), jnp.float32,
                               -bound, bound)
        b = jax.random.uniform(kb, (dims[i + 1], 1), jnp.float32,
                               -bound, bound)
        raw.append((w, b))
    (w1, b1), (w2, b2), (w3, b3) = raw

    w1_full = jnp.pad(w1, ((0, 0), (0, k_pad - input_size)))  # [H1, k_pad]
    w3_col = w3.T                                              # [H2, 1]

    bf = lambda a: a.astype(jnp.bfloat16)
    return (bf(w1_full), b1, bf(w2), b2, w3_col, b3)


# ----------------------------------- main -------------------------------------
if __name__ == "__main__":
    key = jax.random.PRNGKey(0)

    # Synthetic architecture_config / vocab setup (mirrors __init__ logic).
    # TODO(synk): activation/output_transform are hard-coded to the defaults
    # (ReLU / Sigmoid); the torch importlib-based dynamic lookup has no direct
    # Pallas equivalent.
    numeric_feature_names = sorted(["num_a", "num_b", "num_c"])
    categorical_feature_names = sorted(["cat_x", "cat_y"])
    vocab_sizes_map = {"cat_x": 7, "cat_y": 5}     # max(vocab.values()) + 1
    vocab_sizes = [vocab_sizes_map[c] for c in categorical_feature_names]
    hidden_units = [32, 16]

    n_num = len(numeric_feature_names)
    input_size = n_num + sum(vocab_sizes)          # 3 + 7 + 5 = 15

    batch = 256
    k_num, k_cx, k_cy, k_param = jax.random.split(key, 4)
    x_dict = {
        "num_a": jax.random.normal(k_num, (batch,), jnp.float32),
        "num_b": jax.random.normal(jax.random.fold_in(k_num, 1), (batch,),
                                   jnp.float32),
        "num_c": jax.random.normal(jax.random.fold_in(k_num, 2), (batch,),
                                   jnp.float32),
        "cat_x": jax.random.randint(k_cx, (batch, 1), 0,
                                    vocab_sizes_map["cat_x"]),
        "cat_y": jax.random.randint(k_cy, (batch, 1), 0,
                                    vocab_sizes_map["cat_y"]),
    }

    params = init_params(k_param, n_num, vocab_sizes, hidden_units, out_dim=1)

    # Preprocess (glue) then run the Pallas MLP kernel (hot path).
    x_num_t, ids_t = preprocessing(x_dict, numeric_feature_names,
                                   categorical_feature_names)
    assert x_num_t.shape == (n_num, batch) and ids_t.shape == (2, batch)

    # Default tm (device-capped) clamps to 128 at batch=256 -> 2-step grid,
    # exercising both the pipeline and the megacore path at this small size.
    out = mlp_forward(x_num_t, ids_t, params, vocab_sizes)
    out = jax.block_until_ready(out)
    assert out.shape == (batch, 1)

    # ------------------------- Reference (plain JAX) -------------------------
    w1_full, b1, w2, b2, w3c, b3 = params
    onehots = [
        (jax.lax.broadcasted_iota(jnp.int32, (batch, v), 1)
         == x_dict[name].astype(jnp.int32)).astype(jnp.float32)
        for name, v in zip(categorical_feature_names, vocab_sizes)
    ]
    x_num_rm = jnp.stack(
        [x_dict[n].astype(jnp.float32) for n in numeric_feature_names], axis=1
    ).astype(jnp.bfloat16).astype(jnp.float32)             # bf16-rounded numerics
    x_full = jnp.concatenate([x_num_rm] + onehots, axis=1)  # [batch, input_size]
    w1_ref = w1_full.astype(jnp.float32)[:, :input_size]

    h = jnp.maximum(x_full @ w1_ref.T + b1.T, 0.0)
    h = jnp.maximum(h @ w2.astype(jnp.float32).T + b2.T, 0.0)
    ref = jax.nn.sigmoid(h @ w3c.astype(jnp.float32) + b3.T)

    assert jnp.allclose(out, ref, atol=5e-3), "mismatch vs reference"

    print("KERNEL_OK")
</pallas_src>

<mosaic_0001>
module attributes {stable_mosaic.version = 11 : i64} {
  func.func @kernel(%arg0: i32, %arg1: memref<3x128xbf16, #tpu.memory_space<vmem>>, %arg2: memref<2x128xi32, #tpu.memory_space<vmem>>, %arg3: memref<32x16xbf16, #tpu.memory_space<vmem>>, %arg4: memref<32x1xbf16, #tpu.memory_space<vmem>>, %arg5: memref<16x32xbf16, #tpu.memory_space<vmem>>, %arg6: memref<16x1xf32, #tpu.memory_space<vmem>>, %arg7: memref<16x1xf32, #tpu.memory_space<vmem>>, %arg8: memref<1x1xf32, #tpu.memory_space<vmem>>, %arg9: memref<1x128xf32, #tpu.memory_space<vmem>>) attributes {dimension_semantics = [#tpu.dimension_semantics<parallel>], iteration_bounds = array<i64: 2>, scalar_prefetch = 0 : i64, scratch_operands = 0 : i64, tpu.core_type = #tpu.core_type<tc>, window_params = [{transform_indices = @transform_0, window_bounds = array<i64: 3, 128>}, {transform_indices = @transform_1, window_bounds = array<i64: 2, 128>}, {pipeline_mode = #tpu.pipeline_mode<synchronous>, transform_indices = @transform_2, window_bounds = array<i64: 32, 16>}, {pipeline_mode = #tpu.pipeline_mode<synchronous>, transform_indices = @transform_3, window_bounds = array<i64: 32, 1>}, {pipeline_mode = #tpu.pipeline_mode<synchronous>, transform_indices = @transform_4, window_bounds = array<i64: 16, 32>}, {pipeline_mode = #tpu.pipeline_mode<synchronous>, transform_indices = @transform_5, window_bounds = array<i64: 16, 1>}, {pipeline_mode = #tpu.pipeline_mode<synchronous>, transform_indices = @transform_6, window_bounds = array<i64: 16, 1>}, {pipeline_mode = #tpu.pipeline_mode<synchronous>, transform_indices = @transform_7, window_bounds = array<i64: 1, 1>}, {transform_indices = @transform_8, window_bounds = array<i64: 1, 128>}]} {
    %c0 = arith.constant 0 : index
    %c0_0 = arith.constant 0 : index
    %0 = vector.load %arg1[%c0, %c0_0] : memref<3x128xbf16, #tpu.memory_space<vmem>>, vector<3x128xbf16>
    %1 = arith.extf %0 : vector<3x128xbf16> to vector<3x128xf32>
    %c0_1 = arith.constant 0 : index
    %c0_2 = arith.constant 0 : index
    %2 = vector.load %arg2[%c0_1, %c0_2] : memref<2x128xi32, #tpu.memory_space<vmem>>, vector<1x128xi32>
    %3 = tpu.iota {dimensions = array<i32: 0>} : vector<7x128xi32>
    %4 = vector.broadcast %2 : vector<1x128xi32> to vector<7x128xi32>
    %5 = arith.cmpi eq, %3, %4 : vector<7x128xi32>
    %6 = arith.extui %5 : vector<7x128xi1> to vector<7x128xi32>
    %7 = arith.sitofp %6 : vector<7x128xi32> to vector<7x128xf32>
    %c1 = arith.constant 1 : index
    %c0_3 = arith.constant 0 : index
    %8 = vector.load %arg2[%c1, %c0_3] : memref<2x128xi32, #tpu.memory_space<vmem>>, vector<1x128xi32>
    %9 = tpu.iota {dimensions = array<i32: 0>} : vector<5x128xi32>
    %10 = vector.broadcast %8 : vector<1x128xi32> to vector<5x128xi32>
    %11 = arith.cmpi eq, %9, %10 : vector<5x128xi32>
    %12 = arith.extui %11 : vector<5x128xi1> to vector<5x128xi32>
    %13 = arith.sitofp %12 : vector<5x128xi32> to vector<5x128xf32>
    %cst = arith.constant 0.000000e+00 : f32
    %14 = vector.broadcast %cst : f32 to vector<1x128xf32>
    %15 = tpu.concatenate %1, %7, %13, %14 in 0 : vector<3x128xf32>, vector<7x128xf32>, vector<5x128xf32>, vector<1x128xf32> -> vector<16x128xf32>
    %16 = arith.truncf %15 : vector<16x128xf32> to vector<16x128xbf16>
    %c0_4 = arith.constant 0 : index
    %c0_5 = arith.constant 0 : index
    %17 = vector.load %arg3[%c0_4, %c0_5] : memref<32x16xbf16, #tpu.memory_space<vmem>>, vector<32x16xbf16>
    %cst_6 = arith.constant dense<0.000000e+00> : vector<32x128xf32>
    %18 = tpu.matmul %17, %16, %cst_6 {dimension_numbers = #tpu.dot_dimension_numbers<[1], [0], [0], [1], [0, 0, 1, 1], [], []>} : vector<32x16xbf16>, vector<16x128xbf16>, vector<32x128xf32> -> vector<32x128xf32>
    %19 = arith.truncf %18 : vector<32x128xf32> to vector<32x128xbf16>
    %c0_7 = arith.constant 0 : index
    %c0_8 = arith.constant 0 : index
    %20 = vector.load %arg4[%c0_7, %c0_8] : memref<32x1xbf16, #tpu.memory_space<vmem>>, vector<32x1xbf16>
    %21 = vector.broadcast %20 : vector<32x1xbf16> to vector<32x128xbf16>
    %22 = arith.addf %19, %21 : vector<32x128xbf16>
    %cst_9 = arith.constant 0.000000e+00 : bf16
    %23 = vector.broadcast %cst_9 : bf16 to vector<32x128xbf16>
    %24 = arith.maximumf %22, %23 : vector<32x128xbf16>
    %c0_10 = arith.constant 0 : index
    %c0_11 = arith.constant 0 : index
    %25 = vector.load %arg5[%c0_10, %c0_11] : memref<16x32xbf16, #tpu.memory_space<vmem>>, vector<16x32xbf16>
    %cst_12 = arith.constant dense<0.000000e+00> : vector<16x128xf32>
    %26 = tpu.matmul %25, %24, %cst_12 {dimension_numbers = #tpu.dot_dimension_numbers<[1], [0], [0], [1], [0, 0, 1, 1], [], []>} : vector<16x32xbf16>, vector<32x128xbf16>, vector<16x128xf32> -> vector<16x128xf32>
    %c0_13 = arith.constant 0 : index
    %c0_14 = arith.constant 0 : index
    %27 = vector.load %arg6[%c0_13, %c0_14] : memref<16x1xf32, #tpu.memory_space<vmem>>, vector<16x1xf32>
    %28 = vector.broadcast %27 : vector<16x1xf32> to vector<16x128xf32>
    %29 = arith.addf %26, %28 : vector<16x128xf32>
    %cst_15 = arith.constant 0.000000e+00 : f32
    %30 = vector.broadcast %cst_15 : f32 to vector<16x128xf32>
    %31 = arith.maximumf %29, %30 : vector<16x128xf32>
    %c0_16 = arith.constant 0 : index
    %c0_17 = arith.constant 0 : index
    %32 = vector.load %arg7[%c0_16, %c0_17] : memref<16x1xf32, #tpu.memory_space<vmem>>, vector<16x1xf32>
    %33 = vector.broadcast %32 : vector<16x1xf32> to vector<16x128xf32>
    %34 = arith.mulf %31, %33 : vector<16x128xf32>
    %cst_18 = arith.constant dense<0.000000e+00> : vector<128xf32>
    %35 = vector.multi_reduction <add>, %34, %cst_18 [0] : vector<16x128xf32> to vector<128xf32>
    %36 = vector.shape_cast %35 : vector<128xf32> to vector<1x128xf32>
    %c0_19 = arith.constant 0 : index
    %c0_20 = arith.constant 0 : index
    %37 = vector.load %arg8[%c0_19, %c0_20] : memref<1x1xf32, #tpu.memory_space<vmem>>, vector<1x1xf32>
    %38 = vector.broadcast %37 : vector<1x1xf32> to vector<1x128xf32>
    %39 = arith.addf %36, %38 : vector<1x128xf32>
    %cst_21 = arith.constant 0.000000e+00 : f32
    %40 = vector.broadcast %cst_21 : f32 to vector<1x128xf32>
    %41 = arith.subf %40, %39 : vector<1x128xf32>
    %42 = math.exp %41 : vector<1x128xf32>
    %cst_22 = arith.constant 1.000000e+00 : f32
    %43 = vector.broadcast %cst_22 : f32 to vector<1x128xf32>
    %44 = arith.addf %43, %42 : vector<1x128xf32>
    %cst_23 = arith.constant 1.000000e+00 : f32
    %45 = vector.broadcast %cst_23 : f32 to vector<1x128xf32>
    %46 = arith.divf %45, %44 : vector<1x128xf32>
    %c0_24 = arith.constant 0 : index
    %c0_25 = arith.constant 0 : index
    %47 = vector.load %arg9[%c0_24, %c0_25] : memref<1x128xf32, #tpu.memory_space<vmem>>, vector<1x128xf32>
    tpu.vector_store %arg9[%c0_24, %c0_25], %46 {strides = array<i32>} : memref<1x128xf32, #tpu.memory_space<vmem>>, vector<1x128xf32>,
    return
  }
  func.func @transform_0(%arg0: i32) -> (i32, i32) {
    %c0_i32 = arith.constant 0 : i32
    %c0_i32_0 = arith.constant 0 : i32
    return %c0_i32, %arg0 : i32, i32
  }
  func.func @transform_1(%arg0: i32) -> (i32, i32) {
    %c0_i32 = arith.constant 0 : i32
    %c0_i32_0 = arith.constant 0 : i32
    return %c0_i32, %arg0 : i32, i32
  }
  func.func @transform_2(%arg0: i32) -> (i32, i32) {
    %c0_i32 = arith.constant 0 : i32
    %c0_i32_0 = arith.constant 0 : i32
    %c0_i32_1 = arith.constant 0 : i32
    return %c0_i32, %c0_i32_0 : i32, i32
  }
  func.func @transform_3(%arg0: i32) -> (i32, i32) {
    %c0_i32 = arith.constant 0 : i32
    %c0_i32_0 = arith.constant 0 : i32
    %c0_i32_1 = arith.constant 0 : i32
    return %c0_i32, %c0_i32_0 : i32, i32
  }
  func.func @transform_4(%arg0: i32) -> (i32, i32) {
    %c0_i32 = arith.constant 0 : i32
    %c0_i32_0 = arith.constant 0 : i32
    %c0_i32_1 = arith.constant 0 : i32
    return %c0_i32, %c0_i32_0 : i32, i32
  }
  func.func @transform_5(%arg0: i32) -> (i32, i32) {
    %c0_i32 = arith.constant 0 : i32
    %c0_i32_0 = arith.constant 0 : i32
    %c0_i32_1 = arith.constant 0 : i32
    return %c0_i32, %c0_i32_0 : i32, i32
  }
  func.func @transform_6(%arg0: i32) -> (i32, i32) {
    %c0_i32 = arith.constant 0 : i32
    %c0_i32_0 = arith.constant 0 : i32
    %c0_i32_1 = arith.constant 0 : i32
    return %c0_i32, %c0_i32_0 : i32, i32
  }
  func.func @transform_7(%arg0: i32) -> (i32, i32) {
    %c0_i32 = arith.constant 0 : i32
    %c0_i32_0 = arith.constant 0 : i32
    %c0_i32_1 = arith.constant 0 : i32
    return %c0_i32, %c0_i32_0 : i32, i32
  }
  func.func @transform_8(%arg0: i32) -> (i32, i32) {
    %c0_i32 = arith.constant 0 : i32
    %c0_i32_0 = arith.constant 0 : i32
    return %c0_i32, %arg0 : i32, i32
  }
}

</mosaic_0001>

<bundles_post_ra>
// kernel: tpu_custom_call.1
= control target key start
LH: loop header
LB: loop body
LE: loop exit
PB: predicated region body
PF: predicated region fallthrough
CT: control target
= control target key end

     0   :  { %s1752_s0 = inlined_call_operand.hbm [shape: bf16[3,256], index: 0, kind: input, shape index: {}]   ;;  %s1753_s1 = inlined_call_operand.hbm [shape: s32[2,256], index: 1, kind: input, shape index: {}]   ;;  %s1754_s2 = inlined_call_operand.hbm [shape: bf16[32,16], index: 2, kind: input, shape index: {}]   ;;  %s1755_s3 = inlined_call_operand.hbm [shape: bf16[32,1], index: 3, kind: input, shape index: {}]   ;;  %s1756_s4 = inlined_call_operand.hbm [shape: bf16[16,32], index: 4, kind: input, shape index: {}]   ;;  %s1757_s5 = inlined_call_operand.hbm [shape: f32[16,1], index: 5, kind: input, shape index: {}]   ;;  %s1758_s6 = inlined_call_operand.hbm [shape: f32[16,1], index: 6, kind: input, shape index: {}]   ;;  %s1759_s7 = inlined_call_operand.<no memory space> [shape: f32[1,1], index: 7, kind: input, shape index: {}]   ;;  %s1760_s8 = inlined_call_operand.hbm [shape: f32[1,256], index: 8, kind: output, shape index: {}]  }
   0x1   :  { %1767 = sst [smem:[#allocation22_spill]] %s1754_s2  ;;  %v13_v0 = vstv %s1759_s7 }
   0x2   :  { %1768 = sst [smem:[#allocation23_spill]] %s1755_s3  ;;  %14 = vst [vmem:[#allocation2] sm:$0x1] %v13_v0 }
   0x3   :  { %1769 = sst [smem:[#allocation24_spill]] %s1756_s4 }
   0x4   :  { %1770 = sst [smem:[#allocation25_spill]] %s1757_s5 }
   0x5   :  { %15 = vsyncpa [#allocation4], 0 }
   0x6   :  { %17 = vsyncpa [#allocation4 + $0x1], 0 }
   0x7   :  { %18 = vsyncpa [#allocation7], 0 }
   0x8   :  { %20 = vsyncpa [#allocation7 + $0x1], 0 }
   0x9   :  { %21 = vsyncpa [#allocation10], 0 }
   0xa   :  { %22 = vsyncpa [#allocation13], 0 }
   0xb   :  { %23 = vsyncpa [#allocation5], 0 }
   0xc   :  { %25 = vsyncpa [#allocation5 + $0x1], 0  ;;  %s1386_s29 = smov 0   ;;  %s1388_s30 = smov 0  }
   0xd   :  { %s1390_s9 = smov 0   ;;  %s1392_s10 = smov 0  }
   0xe LB: > { %s1321_s7 = smov [#allocation8]   ;;  %s1407_s12 = sadd.s32 4294967295, %s1319_s10   ;;  %s1319_s10 = sphi %s1392_s10, %s1799_s10   ;;  %s1315_s9 = sphi %s1390_s9, %s1798_s9   ;;  %s1311_s30 = sphi %s1388_s30, %s1797_s30   ;;  %s1307_s29 = sphi %s1386_s29, %s1796_s29  }
   0xf   : > { %s252_s11 = sshll.u32 %s1321_s7, 4  ;;  %p860_p0 = scmp.ge.s32.totalorder %s1319_s10, 1  ;;  %s1412_s11 = int_to_ptr.vmem [resolvable:$true] %s252_s11 }
  0x10   : > { %p1763_p1 = scmp.eq.s32.totalorder %s1407_s12, 0  ;;  %p240_p2 = scmp.lt.s32.totalorder %s1319_s10, 3 }
  0x11   : > { %s1322_s14 = smov [#allocation9]   ;;  %s1323_s17 = smov [#allocation12]  }
  0x12   : > { %p1414_p3 = pnand %p860_p0, %p240_p2  ;;  %s265_s15 = sshll.u32 %s1322_s14, 4  ;;  %s1427_s15 = int_to_ptr.vmem [resolvable:$true] %s265_s15 }
  0x13   : > { %s291_s18 = sshll.u32 %s1323_s17, 4  ;;  %s1773_s2 = sld [smem:[#allocation22_spill]]  ;;  %s1429_s18 = int_to_ptr.vmem [resolvable:$true] %s291_s18 }
  0x14   : > { %s1771_s13 = scalar_select %p1414_p3, 1, 0 }
  0x15   : > { %p943_p5 = pneg %p1414_p3 }
  0x17   : > { %p1423_p6 = pnand %p943_p5, %p1763_p1 }
  0x19   : > { %s1037_s21 = scalar_lea.hbm %s1773_s2, 256  ;;  %p1439_p8 = pneg %p1423_p6 }
  0x1a   : > { %p1038_p7 = scmp.ne.s32.totalorder %s1773_s2, %s1037_s21  ;;  %p1044_p11 = scmp.lt.u32.totalorder %s1037_s21, %s1773_s2 }
  0x1c   : > { %p1040_p9 = pnand %p1439_p8, %p1038_p7 }
  0x1e   : > { %p1041_p10 = pneg %p1040_p9 }
  0x20   : > { %p1046_p12 = pnand %p1044_p11, %p1041_p10 }
  0x22   : > { %1049 = shalt.err (!%p1046_p12)
}
  0x23   : > { %s1050_s27 = scalar_lea.vmem %s1412_s11, 256  ;;  %p1058_p5 = scmp.lt.s32.totalorder %s1412_s11, %s1412_s11 }
  0x24   : > { %p1051_p13 = scmp.ne.s32.totalorder %s1412_s11, %s1050_s27  ;;  %p1059_p4 = scmp.lt.s32.totalorder %s1050_s27, %s1050_s27 }
  0x26   : > { %p1053_p0 = pnand %p1051_p13, %p1439_p8  ;;  %p1060_p7 = por %p1059_p4, %p1058_p5 }
  0x28   : > { %p1054_p2 = pneg %p1053_p0 }
  0x2a   : > { %p1061_p9 = pnand %p1060_p7, %p1054_p2 }
  0x2c   : > { %1064 = shalt.err (!%p1061_p9)
}
  0x2d   : > { %s1761_s28 = smov 64   ;;  %s1762_s7 = smov 4  }
  0x2e   : > { %946 = dma.hbm_to_vmem [thread:$0]  (!%p1423_p6), %s1773_s2, 256, %s1412_s11, [#allocation7], %s1761_s28, %s1761_s28, %s1762_s7  }
  0x2f   : > { %s1775_s3 = sld [smem:[#allocation23_spill]] }
  0x35   : > { %s1065_s21 = scalar_lea.hbm %s1775_s3, 256 }
  0x36   : > { %p1066_p4 = scmp.ne.s32.totalorder %s1775_s3, %s1065_s21  ;;  %p1072_p12 = scmp.lt.u32.totalorder %s1065_s21, %s1775_s3 }
  0x38   : > { %p1068_p10 = pnand %p1066_p4, %p1439_p8 }
  0x3a   : > { %p1069_p11 = pneg %p1068_p10 }
  0x3c   : > { %p1074_p13 = pnand %p1072_p12, %p1069_p11 }
  0x3e   : > { %1077 = shalt.err (!%p1074_p13)
}
  0x3f   : > { %s1078_s11 = scalar_lea.vmem %s1427_s15, 256  ;;  %p1086_p7 = scmp.lt.s32.totalorder %s1427_s15, %s1427_s15 }
  0x40   : > { %p1079_p0 = scmp.ne.s32.totalorder %s1427_s15, %s1078_s11  ;;  %p1087_p9 = scmp.lt.s32.totalorder %s1078_s11, %s1078_s11 }
  0x42   : > { %p1081_p2 = pnand %p1079_p0, %p1439_p8  ;;  %p1088_p4 = por %p1087_p9, %p1086_p7 }
  0x44   : > { %p1082_p5 = pneg %p1081_p2 }
  0x46   : > { %p1089_p10 = pnand %p1088_p4, %p1082_p5 }
  0x48   : > { %1092 = shalt.err (!%p1089_p10)
}
  0x49   : > { %949 = dma.hbm_to_vmem [thread:$0]  (!%p1423_p6), %s1775_s3, 256, %s1427_s15, [#allocation10], %s1761_s28, %s1761_s28, %s1762_s7  }
  0x4a   : > { %s1776_s5 = sld [smem:[#allocation25_spill]] }
  0x50   : > { %s1093_s20 = scalar_lea.hbm %s1776_s5, 256 }
  0x51   : > { %p1094_p11 = scmp.ne.s32.totalorder %s1776_s5, %s1093_s20  ;;  %p1100_p0 = scmp.lt.u32.totalorder %s1093_s20, %s1776_s5 }
  0x53   : > { %p1096_p12 = pnand %p1094_p11, %p1439_p8 }
  0x55   : > { %p1097_p13 = pneg %p1096_p12 }
  0x57   : > { %p1102_p2 = pnand %p1100_p0, %p1097_p13 }
  0x59   : > { %1105 = shalt.err (!%p1102_p2)
}
  0x5a   : > { %s1106_s15 = scalar_lea.vmem %s1429_s18, 256  ;;  %p1114_p4 = scmp.lt.s32.totalorder %s1429_s18, %s1429_s18 }
  0x5b   : > { %p1107_p5 = scmp.ne.s32.totalorder %s1429_s18, %s1106_s15  ;;  %p1115_p10 = scmp.lt.s32.totalorder %s1106_s15, %s1106_s15 }
  0x5d   : > { %p1109_p7 = pnand %p1107_p5, %p1439_p8  ;;  %p1116_p11 = por %p1115_p10, %p1114_p4 }
  0x5f   : > { %p1110_p9 = pneg %p1109_p7 }
  0x61   : > { %p1117_p12 = pnand %p1116_p11, %p1110_p9 }
  0x63   : > { %1120 = shalt.err (!%p1117_p12)
}
  0x64   : > { %s1326_s26 = smov 128   ;;  %s1327_s11 = smov 8  }
  0x65   : > { %955 = dma.hbm_to_vmem [thread:$0]  (!%p1423_p6), %s1776_s5, 256, %s1429_s18, [#allocation13], %s1326_s26, %s1326_s26, %s1327_s11  }
  0x66   : > { %s1328_s17 = smov [#allocation11]   ;;  %s1329_s20 = smov [#allocation14]  }
  0x67   : > { %s278_s19 = sshll.u32 %s1328_s17, 4  ;;  %s304_s21 = sshll.u32 %s1329_s20, 4  ;;  %s279_s19 = int_to_ptr.vmem [resolvable:$true] %s278_s19  ;;  %s305_s21 = int_to_ptr.vmem [resolvable:$true] %s304_s21 }
  0x68   : > { %s1777_s4 = sld [smem:[#allocation24_spill]] }
  0x6e   : > { %s1121_s25 = scalar_lea.hbm %s1777_s4, 128 }
  0x6f   : > { %p1122_p13 = scmp.ne.s32.totalorder %s1777_s4, %s1121_s25  ;;  %p1128_p5 = scmp.lt.u32.totalorder %s1121_s25, %s1777_s4 }
  0x71   : > { %p1124_p0 = pnand %p1122_p13, %p1439_p8 }
  0x73   : > { %p1125_p2 = pneg %p1124_p0 }
  0x75   : > { %p1130_p7 = pnand %p1128_p5, %p1125_p2 }
  0x77   : > { %1133 = shalt.err (!%p1130_p7)
}
  0x78   : > { %s1134_s18 = scalar_lea.vmem %s279_s19, 128  ;;  %p1142_p11 = scmp.lt.s32.totalorder %s279_s19, %s279_s19 }
  0x79   : > { %p1135_p9 = scmp.ne.s32.totalorder %s279_s19, %s1134_s18  ;;  %p1143_p12 = scmp.lt.s32.totalorder %s1134_s18, %s1134_s18 }
  0x7b   : > { %p1137_p4 = pnand %p1135_p9, %p1439_p8  ;;  %p1144_p1 = por %p1143_p12, %p1142_p11 }
  0x7d   : > { %p1138_p10 = pneg %p1137_p4 }
  0x7f   : > { %p1145_p3 = pnand %p1144_p1, %p1138_p10 }
  0x81   : > { %1148 = shalt.err (!%p1145_p3)
}
  0x82   : > { %s1778_s28 = smov 4   ;;  %s1779_s27 = smov 64  }
  0x83   : > { %952 = dma.hbm_to_vmem [thread:$0]  (!%p1423_p6), %s1777_s4, 128, %s279_s19, [#allocation10], %s1779_s27, %s1779_s27, %s1778_s28  }
  0x84   : > { %s1149_s20 = scalar_lea.hbm %s1758_s6, 256 }
  0x85   : > { %p1150_p1 = scmp.ne.s32.totalorder %s1758_s6, %s1149_s20  ;;  %p1156_p0 = scmp.lt.u32.totalorder %s1149_s20, %s1758_s6 }
  0x87   : > { %p1152_p3 = pnand %p1150_p1, %p1439_p8 }
  0x89   : > { %p1153_p13 = pneg %p1152_p3 }
  0x8b   : > { %p1158_p2 = pnand %p1156_p0, %p1153_p13 }
  0x8d   : > { %1161 = shalt.err (!%p1158_p2)
}
  0x8e   : > { %s1162_s18 = scalar_lea.vmem %s305_s21, 256  ;;  %p1170_p4 = scmp.lt.s32.totalorder %s305_s21, %s305_s21 }
  0x8f   : > { %p1163_p5 = scmp.ne.s32.totalorder %s305_s21, %s1162_s18  ;;  %p1171_p10 = scmp.lt.s32.totalorder %s1162_s18, %s1162_s18 }
  0x91   : > { %p1165_p7 = pnand %p1163_p5, %p1439_p8  ;;  %p1172_p11 = por %p1171_p10, %p1170_p4 }
  0x93   : > { %p1166_p9 = pneg %p1165_p7 }
  0x95   : > { %p1173_p12 = pnand %p1172_p11, %p1166_p9 }
  0x97   : > { %1176 = shalt.err (!%p1173_p12)
}
  0x98   : > { %958 = dma.hbm_to_vmem [thread:$0]  (!%p1423_p6), %s1758_s6, 256, %s305_s21, [#allocation13], %s1326_s26, %s1326_s26, %s1327_s11  }
  0x99   : > { %s859_s16 = sadd.s32 4294967294, %s1319_s10   ;;  %s1559_s24 = sadd.s32 1, %s1319_s10  }
  0x9a   : > { %s38_s27 = sadd.s32 1, %s1315_s9  ;;  %s35_s2 = ssub.s32 %s1319_s10, %s1559_s24 }
  0x9b   : > { %p45_p8 = scmp.ne.s32.totalorder %s1315_s9, %s1311_s30  ;;  %p36_p1 = scmp.eq.s32.totalorder %s35_s2, 0 }
  0x9c   : > { %p46_p3 = scmp.eq.s32.totalorder %s1319_s10, 0  ;;  %p51_p13 = scmp.ne.s32.totalorder %s1311_s30, %s1307_s29 }
  0x9d   : > { %p227_p0 = scmp.eq.s32.totalorder %s1407_s12, 1  ;;  %p1780_p5 = scmp.eq.s32.totalorder %s1407_s12, 0 }
  0x9e   : > { %s1571_s7 = scalar_select %p36_p1, %s1315_s9, %s38_s27  }
  0x9f   : > { %p47_p2 = por %p46_p3, %p45_p8  ;;  %p1575_p7 = por %p1780_p5, %p51_p13 }
  0xa0   : > { %p1579_p6 = por %p227_p0, %p45_p8  ;;  %p233_p9 = scmp.eq.s32.totalorder %s859_s16, 1 }
  0xa1   : > { %s1781_s14 = scalar_select %p1575_p7, 1, 0 }
  0xa2   : > { %s1782_s26 = scalar_select %p1579_p6, 1, 0 }
  0xa3   : > { %p975_p4 = scmp.lt.s32.totalorder %s1319_s10, 2  ;;  %s321_s11 = sand.u32 1, %s1315_s9  }
  0xa4   : > { %p1585_p10 = por %p233_p9, %p51_p13  ;;  %s1589_s17 = sshll.u32 %s321_s11, 1 }
  0xa5   : > { %s868_s20 = sshll.u32 %s1319_s10, 5  ;;  %s325_s15 = scalar_lea.vmem [#allocation3], %s1589_s17 }
  0xa6   : > { %s1783_s21 = scalar_select %p1585_p10, 1, 0 }
  0xa7   : > { %s1595_s25 = scalar_lea.hbm %s1752_s0, %s868_s20  ;;  %s332_s18 = sshll.u32 %s325_s15, 4  ;;  %s1602_s18 = int_to_ptr.vmem [resolvable:$true] %s332_s18 }
  0xa8   : > { %p1598_p11 = pnand %p975_p4, %p47_p2  ;;  %s1607_s27 = scalar_lea.hbm %s1753_s1, %s868_s20 }
  0xa9   : > { %s322_s2 = scalar_lea.sflag [#allocation4], %s321_s11  ;;  %s1177_s22 = scalar_lea.hbm %s1595_s25, 32 }
  0xaa   : > { %p1178_p12 = scmp.ne.s32.totalorder %s1595_s25, %s1177_s22  ;;  %p1179_p8 = pneg %p1598_p11 }
  0xab   : > { %s1182_s3 = scalar_lea.hbm %s1752_s0, 64  ;;  %p1183_p13 = scmp.lt.u32.totalorder %s1595_s25, %s1752_s0 }
  0xac   : > { %p1180_p1 = pnand %p1179_p8, %p1178_p12  ;;  %p1184_p0 = scmp.lt.u32.totalorder %s1182_s3, %s1177_s22 }
  0xad   : > { %p1186_p5 = scmp.lt.u32.totalorder %s1177_s22, %s1595_s25 }
  0xae   : > { %p1181_p3 = pneg %p1180_p1  ;;  %p1185_p2 = por %p1184_p0, %p1183_p13 }
  0xb0   : > { %p1187_p9 = por %p1186_p5, %p1185_p2 }
  0xb2   : > { %p1188_p4 = pnand %p1187_p9, %p1181_p3 }
  0xb4   : > { %1191 = shalt.err (!%p1188_p4)
}
  0xb5   : > { %s1192_s11 = scalar_lea.vmem %s1602_s18, 32  ;;  %s1330_s20 = smov [#allocation3]  }
  0xb6   : > { %p1193_p12 = scmp.ne.s32.totalorder %s1602_s18, %s1192_s11  ;;  %s1197_s28 = sshll.u32 %s1330_s20, 4  ;;  %s1198_s28 = int_to_ptr.vmem [resolvable:$false] %s1197_s28 }
  0xb7   : > { %s1199_s4 = scalar_lea.vmem %s1198_s28, 64  ;;  %p1200_p6 = scmp.lt.s32.totalorder %s1602_s18, %s1198_s28 }
  0xb8   : > { %p1195_p1 = pnand %p1193_p12, %p1179_p8  ;;  %p1201_p13 = scmp.lt.s32.totalorder %s1199_s4, %s1192_s11 }
  0xba   : > { %p1196_p10 = pneg %p1195_p1  ;;  %p1202_p0 = por %p1201_p13, %p1200_p6 }
  0xbc   : > { %p1203_p2 = pnand %p1202_p0, %p1196_p10 }
  0xbe   : > { %1206 = shalt.err (!%p1203_p2)
}
  0xbf   : > { %962 = dma.hbm_to_vmem [thread:$0]  (!%p1598_p11), %s1595_s25, 32, %s1602_s18, %s322_s2  }
  0xc0   : > { %s339_s3 = sand.u32 1, %s1319_s10   ;;  %s343_s5 = scalar_lea.vmem [#allocation6], %s1589_s17 }
  0xc1   : > { %s350_s16 = sshll.u32 %s343_s5, 4  ;;  %s340_s22 = scalar_lea.sflag [#allocation7], %s339_s3  ;;  %s351_s16 = int_to_ptr.vmem [resolvable:$true] %s350_s16 }
  0xc2   : > { %s1207_s23 = scalar_lea.hbm %s1607_s27, 32  ;;  %s1212_s20 = scalar_lea.hbm %s1753_s1, 64 }
  0xc3   : > { %p1208_p6 = scmp.ne.s32.totalorder %s1607_s27, %s1207_s23  ;;  %p1213_p5 = scmp.lt.u32.totalorder %s1607_s27, %s1753_s1 }
  0xc4   : > { %p1214_p9 = scmp.lt.u32.totalorder %s1212_s20, %s1207_s23  ;;  %p1216_p12 = scmp.lt.u32.totalorder %s1207_s23, %s1607_s27 }
  0xc5   : > { %p1210_p10 = pnand %p1208_p6, %p1179_p8 }
  0xc6   : > { %p1215_p4 = por %p1214_p9, %p1213_p5 }
  0xc7   : > { %p1211_p3 = pneg %p1210_p10 }
  0xc8   : > { %p1217_p1 = por %p1216_p12, %p1215_p4 }
  0xca   : > { %p1218_p13 = pnand %p1217_p1, %p1211_p3 }
  0xcc   : > { %1221 = shalt.err (!%p1218_p13)
}
  0xcd   : > { %s1222_s17 = scalar_lea.vmem %s351_s16, 32  ;;  %s1331_s25 = smov [#allocation6]  }
  0xce   : > { %p1223_p0 = scmp.ne.s32.totalorder %s351_s16, %s1222_s17  ;;  %s1227_s18 = sshll.u32 %s1331_s25, 4  ;;  %s1228_s18 = int_to_ptr.vmem [resolvable:$false] %s1227_s18 }
  0xcf   : > { %s1229_s2 = scalar_lea.vmem %s1228_s18, 64  ;;  %p1230_p10 = scmp.lt.s32.totalorder %s351_s16, %s1228_s18 }
  0xd0   : > { %p1225_p2 = pnand %p1223_p0, %p1179_p8  ;;  %p1231_p7 = scmp.lt.s32.totalorder %s1229_s2, %s1222_s17 }
  0xd2   : > { %p1226_p6 = pneg %p1225_p2  ;;  %p1232_p5 = por %p1231_p7, %p1230_p10 }
  0xd4   : > { %p1233_p9 = pnand %p1232_p5, %p1226_p6 }
  0xd6   : > { %1236 = shalt.err (!%p1233_p9)
}
  0xd7   : > { %965 = dma.hbm_to_vmem [thread:$0]  (!%p1598_p11), %s1607_s27, 32, %s351_s16, %s340_s22  }
  0xd8   : > { %p1785_p3 = scmp.ne.s32.totalorder %s1771_s13, 0 }
  0xd9   : > { %s1658_s3 = sand.u32 (!%p1785_p3), 1, %s1311_s30   ;;  %p1786_p8 = scmp.ne.s32.totalorder (!%p1785_p3), %s1781_s14, 0 }
  0xda   : > { %359 = sbr.rel (%p1785_p3) target bundleno = 759 (0x2f7), region = 52  ;;  %s872_s5 = sshll.u32 (!%p1785_p3), %s1658_s3, 1 }
  0xdb   : > { %s362_s23 = scalar_lea.sflag (!%p1785_p3), [#allocation4], %s1658_s3  ;;  %s365_s15 = scalar_lea.vmem (!%p1785_p3), [#allocation3], %s872_s5 }
  0xe1   : > { %1282 = dma.done.wait (%p1786_p8), %s362_s23, 32  }
  0xe2   : > { %1284 = vsyncadd (%p1786_p8), %s362_s23, 4294967264  ;;  %s370_s19 = sand.u32 1, %s1407_s12   ;;  %s374_s13 = scalar_lea.vmem [#allocation6], %s872_s5 }
  0xe3   : > { %s371_s27 = scalar_lea.sflag [#allocation7], %s370_s19 }
  0xe4   : > { %1286 = dma.done.wait (%p1786_p8), %s371_s27, 32  }
  0xe5   : > { %1288 = vsyncadd (%p1786_p8), %s371_s27, 4294967264  ;;  %p1787_p7 = scmp.eq.s32.totalorder %s1407_s12, 0 }
  0xe7   : > { %1290 = dma.done.wait (%p1787_p7), [#allocation7], 256   ;;  %p1788_p11 = pmov %p1787_p7 }
  0xe8   : > { %p1789_p4 = pmov %p1787_p7 }
  0xe9   : > { %1292 = vsyncadd (%p1788_p11), [#allocation7], 4294967040 }
  0xea   : > { %1294 = dma.done.wait (%p1789_p4), [#allocation10], 384   ;;  %p1790_p12 = pmov %p1789_p4 }
  0xeb   : > { %p1791_p1 = pmov %p1789_p4 }
  0xec   : > { %1296 = vsyncadd (%p1790_p12), [#allocation10], 4294966912 }
  0xed   : > { %1298 = dma.done.wait (%p1791_p1), [#allocation13], 512   ;;  %p1792_p13 = pmov %p1791_p1 }
  0xee   : > { %v435_v1 = vlaneseq  ;;  %v1332_v2 = vmov 0.0   ;;  %v1333_v3 = vmov 0   ;;  %vm458_vm0 = vcmask 1042432   ;;  %v432_v5 = vld [vmem:[%s365_s15] sm:$0x3]  ;;  %v1030_v9 = vld [vmem:[#allocation8] sm:$0xff]  }
  0xef   : > { %1300 = vsyncadd (%p1792_p13), [#allocation13], 4294966784  ;;  %909 = vmatprep.subr.bf16.mxu1 %v1332_v2  ;;  %1028 = vset.pattern.permute.xlu0 %v1333_v3  ;;  %vm460_vm1 = vcmask 1041408   ;;  %vm462_vm2 = vcmask 1046528   ;;  %vm479_vm3 = vcmask 130048   ;;  %v433_v8 = vunpack.c.l.bf16 %v432_v5  ;;  %v1031_v21 = vld [vmem:[#allocation8 + $0x8] sm:$0xff]  }
  0xf0   : > { %1029 = vset.pattern.permute.xlu1 %v1333_v3  ;;  %v1686_v4 = vshrl.u32 %v435_v1, 7  ;;  %v879_v6 = vld [vmem:[%s374_s13] ss:$0 sm:$0xff]  ;;  %v881_v7 = vld [vmem:[%s374_s13 + $0x1] ss:$0 sm:$0xff]  ;;  %905 = vmatprep.mubr.msk.bf16.mxu0 %vm479_vm3, %v1030_v9  ;;  %vm1334_vm6 = vmmov 1  }
  0xf1   : > { %v537_v14 = vld [vmem:[#allocation9] sm:$0xf]  ;;  %v539_v15 = vld [vmem:[#allocation9 + $0x8] sm:$0xf]  ;;  %vm885_vm7 = vmpackc.low %vm462_vm2, %vm1334_vm6  ;;  %vm1335_vm8 = vmmov 0   ;;  %vm624_vm9 = vcmask 261120  }
  0xf2   : > { %vm441_vm4 = vcmp.eq.s32.totalorder %v1686_v4, %v879_v6  ;;  %vm449_vm5 = vcmp.eq.s32.totalorder %v1686_v4, %v881_v7  ;;  %543 = vperm.xlu0 %1028, %v537_v14   ;;  %v538_v18 = vld [vmem:[#allocation9 + $0x4] sm:$0xf]  ;;  %567 = vperm.xlu1 %1029, %v539_v15   ;;  %v540_v20 = vld [vmem:[#allocation9 + $0xc] sm:$0xf]  ;;  %v607_v22 = vld [vmem:[#allocation12] sm:$0xff]  ;;  %v700_v7 = vsub.s32 0, %v1686_v4 }
  0xf3   : > { %v880_v10 = vsel %vm441_vm4, 1.0, %v1332_v2  ;;  %v882_v11 = vsel %vm449_vm5, 1.0, %v1332_v2  ;;  %v608_v23 = vld [vmem:[#allocation12 + $0x8] sm:$0xff]  ;;  %v671_v24 = vld [vmem:[#allocation14] sm:$0xff]  ;;  %v672_v25 = vld [vmem:[#allocation14 + $0x8] sm:$0xff]  ;;  %913 = vmatprep.mubr.msk.bf16.mxu1 %vm1335_vm8, %v1332_v2  ;;  %s894_s14 = sshll.u32 %s1407_s12, 4 }
  0xf4   : > { %v453_v12 = vrot.slane %v880_v10, 5  ;;  %v456_v13 = vrot.slane %v882_v11, 6  ;;  %v692_v26 = vld [vmem:[#allocation2] sm:$0x1]  ;;  %v1336_v27 = vmov 839922192   ;;  %s1708_s28 = scalar_lea.hbm %s1760_s8, %s894_s14 }
  0xf5   : > { %v547_v28 = vunpack.c.l.s4 %v1336_v27  ;;  %v1032_v51 = vld [vmem:[#allocation11] sm:$0xff]   ;;  %s430_s16 = scalar_lea.vmem [#allocation15], %s1658_s3  ;;  %s711_s4 = scalar_lea.sflag [#allocation5], %s1658_s3 }
  0xf6   : > { %v459_v16 = vsel %vm458_vm0, %v433_v8, %v453_v12  ;;  %v461_v17 = vsel %vm460_vm1, %v453_v12, %v456_v13  ;;  %555 = vperm.xlu0 %1028, %v538_v18   ;;  %579 = vperm.xlu1 %1029, %v540_v20   ;;  %s723_s22 = sshll.u32 %s430_s16, 4  ;;  %p1793_p2 = scmp.ne.s32.totalorder %s1782_s26, 0  ;;  %s1710_s22 = int_to_ptr.vmem [resolvable:$true] %s723_s22 }
  0xf7   : > { %v886_v19 = vpack.c.bf16 %v461_v17, %v459_v16  ;;  %v548_v30 = vunpack.c.0.s8 %v547_v28  ;;  %s1237_s17 = scalar_lea.vmem %s1710_s22, 16  ;;  %s1337_s12 = smov [#allocation15]  }
  0xf8   : > { %p1238_p0 = scmp.ne.s32.totalorder %s1710_s22, %s1237_s17  ;;  %s1241_s25 = sshll.u32 %s1337_s12, 4  ;;  %s1242_s25 = int_to_ptr.vmem [resolvable:$false] %s1241_s25 }
  0xf9   : > { %903 = vmatprep.subr.msk.bf16.mxu0 %vm885_vm7, %v886_v19  ;;  %v551_v32 = vsub.s32 %v548_v30, %v1686_v4  ;;  %s1243_s18 = scalar_lea.vmem %s1242_s25, 32  ;;  %p1244_p5 = scmp.lt.s32.totalorder %s1710_s22, %s1242_s25 }
  0xfa   : > { %904 = vmatpush3.bf16.msk.msra.mxu0 %vm885_vm7, %v886_v19  ;;  %611 = vperm.xlu0 %1028, %v607_v22   ;;  %p1239_p6 = pnand %p1238_p0, %p1793_p2  ;;  %p1245_p9 = scmp.lt.s32.totalorder %s1243_s18, %s1237_s17 }
  0xfb   : > { %616 = vperm.xlu1 %1029, %v608_v23  }
  0xfc   : > { %p1240_p10 = pneg %p1239_p6  ;;  %p1246_p3 = por %p1245_p9, %p1244_p5 }
  0xfd   : > { %906 = vmatmul.mubr.msk.bf16.vlgmr.msra.gmra.mrb[0].mxu0 %vm479_vm3, %v1031_v21 }
  0xfe   : > { %675 = vperm.xlu0 %1028, %v671_v24   ;;  %p1247_p8 = pnand %p1246_p3, %p1240_p10 }
  0xff   : > { %680 = vperm.xlu1 %1029, %v672_v25  }
 0x102   : > { %695 = vperm.xlu0 %1028, %v692_v26  }
 0x171   : > { %v568_v29 = vpop.permute.xlu1 %567  ;;  %v544_v31 = vpop.permute.xlu0 %543 }
 0x172   : > { %v576_v34 = vrot.slane %v568_v29, %v551_v32  ;;  %v552_v37 = vrot.slane %v544_v31, %v551_v32 }
 0x175   : > { %v580_v33 = vpop.permute.xlu1 %579  ;;  %v556_v36 = vpop.permute.xlu0 %555 }
 0x176   : > { %v588_v35 = vrot.slane %v580_v33, %v551_v32  ;;  %v564_v38 = vrot.slane %v556_v36, %v551_v32 }
 0x178   : > { %v891_v40 = vcombine.low %v576_v34, %v588_v35  ;;  %v890_v45 = vcombine.low %v552_v37, %v564_v38 }
 0x179   : > { %v612_v52 = vpop.permute.xlu0 %611 }
 0x17a   : > { %v617_v53 = vpop.permute.xlu1 %616 }
 0x17d   : > { %v676_v62 = vpop.permute.xlu0 %675 }
 0x17e   : > { %v681_v63 = vpop.permute.xlu1 %680 }
 0x181   : > { %v696_v9 = vpop.permute.xlu0 %695 }
 0x182   : > { %v701_v11 = vrot.slane %v696_v9, %v700_v7 }
 0x1d0   : > { %v907_v39 = vpop.f32.mrb[0].mxu0 }
 0x1d1   : > { %v520_v41 = vpop.f32.mrb[1].mxu0 }
 0x1d2   : > { %v908_v42 = vpop.f32.mrb[2].mxu0 }
 0x1d3   : > { %v536_v43 = vpack.c.bf16 %v908_v42, %v907_v39  ;;  %v523_v44 = vpop.f32.mrb[3].mxu0 }
 0x1d4   : > { %v535_v46 = vpack.c.bf16 %v523_v44, %v520_v41 }
 0x1d5   : > { %v602_v47 = vadd.bf16 %v891_v40, %v536_v43 }
 0x1d6   : > { %v601_v48 = vadd.bf16 %v890_v45, %v535_v46 }
 0x1d7   : > { %v604_v50 = vmax.bf16 %v1333_v3, %v602_v47 }
 0x1d8   : > { %v603_v49 = vmax.bf16 %v1333_v3, %v601_v48 }
 0x1da   : > { %910 = vmatpush3.bf16.msra.mxu1 %v603_v49 }
 0x1db   : > { %911 = vmatprep.subr.bf16.mxu1 %v1332_v2 }
 0x1de   : > { %912 = vmatpush3.bf16.msra.mxu1 %v604_v50 }
 0x1e1   : > { %914 = vmatmul.mubr.msk.bf16.vlgmr.msra.gmra.mrb[0].mxu1 %vm624_vm9, %v1032_v51 }
 0x2b4   : > { %v662_v54 = vpop.f32.mrb[0].mxu1 }
 0x2b5   : > { %v663_v55 = vadd.f32 %v662_v54, %v612_v52  ;;  %v915_v56 = vpop.f32.mrb[1].mxu1 }
 0x2b6   : > { %v665_v57 = vpop.f32.mrb[2].mxu1 }
 0x2b7   : > { %v669_v58 = vmax.f32 %v663_v55, 0.0  ;;  %v666_v59 = vadd.f32 %v665_v57, %v617_v53  ;;  %v916_v60 = vpop.f32.mrb[3].mxu1 }
 0x2b9   : > { %v670_v61 = vmax.f32 %v666_v59, 0.0  ;;  %v683_v0 = vmul.f32 %v676_v62, %v669_v58 }
 0x2bb   : > { %v684_v1 = vmul.f32 %v681_v63, %v670_v61 }
 0x2bd   : > { %v685_v2 = vadd.f32 %v684_v1, %v683_v0 }
 0x2bf   : > { %v686_v3 = vrot.slane %v685_v2, 4 }
 0x2c1   : > { %v687_v5 = vadd.f32 %v686_v3, %v685_v2 }
 0x2c3   : > { %v688_v6 = vrot.slane %v687_v5, 2 }
 0x2c5   : > { %v689_v8 = vadd.f32 %v688_v6, %v687_v5 }
 0x2c7   : > { %v690_v10 = vrot.slane %v689_v8, 1 }
 0x2c9   : > { %v691_v12 = vadd.f32 %v690_v10, %v689_v8 }
 0x2cb   : > { %v702_v13 = vadd.f32 %v701_v11, %v691_v12 }
 0x2cd   : > { %v703_v14 = vsub.f32 0.0, %v702_v13 }
 0x2cf   : > { %v704_v15 = vmul.f32 1.442695, %v703_v14 }
 0x2d1   : > { %1033 = vpow2.f32 %v704_v15 }
 0x2db   : > { %v1034_v16 = vpop.eup %1033 }
 0x2dc   : > { %v706_v17 = vadd.f32 1.0, %v1034_v16 }
 0x2de   : > { %1035 = vrcp.f32 %v706_v17 }
 0x2e8   : > { %v1036_v4 = vpop.eup %1035 }
 0x2e9   : > { %709 = vst [vmem:[%s430_s16] sm:$0x1] %v1036_v4 }
 0x2ea   : > { %1250 = shalt.err (!%p1247_p8)
}
 0x2eb   : > { %s1251_s2 = scalar_lea.hbm %s1708_s28, 16  ;;  %s1255_s23 = scalar_lea.hbm %s1760_s8, 32 }
 0x2ec   : > { %p1252_p7 = scmp.ne.s32.totalorder %s1708_s28, %s1251_s2  ;;  %p1256_p12 = scmp.lt.u32.totalorder %s1708_s28, %s1760_s8 }
 0x2ed   : > { %p1257_p1 = scmp.lt.u32.totalorder %s1255_s23, %s1251_s2  ;;  %p1259_p0 = scmp.lt.u32.totalorder %s1251_s2, %s1708_s28 }
 0x2ee   : > { %p1253_p11 = pnand %p1252_p7, %p1793_p2 }
 0x2ef   : > { %p1258_p13 = por %p1257_p1, %p1256_p12 }
 0x2f0   : > { %p1254_p4 = pneg %p1253_p11 }
 0x2f1   : > { %p1260_p6 = por %p1259_p0, %p1258_p13 }
 0x2f3   : > { %p1261_p10 = pnand %p1260_p6, %p1254_p4 }
 0x2f5   : > { %1264 = shalt.err (!%p1261_p10)
}
 0x2f6   : > { %941 = dma.vmem_to_hbm [thread:$0]  (%p1793_p2), %s1710_s22, 16, %s1708_s28, %s711_s4  }
 0x2f7 PF: > { %s735_s27 = sand.u32 1, %s1307_s29   ;;  %p1794_p5 = scmp.ne.s32.totalorder %s1783_s21, 0 }
 0x2f8   : > { %p1795_p9 = scmp.ge.s32.totalorder %s1319_s10, 2  ;;  %s736_s13 = scalar_lea.sflag [#allocation5], %s735_s27 }
 0x2fa   : > { %p967_p3 = pnand %p1795_p9, %p1794_p5 }
 0x2fc   : > { %1302 = dma.done.wait (!%p967_p3), %s736_s13, 16  }
 0x2fd   : > { %1304 = vsyncadd (!%p967_p3), %s736_s13, 4294967280  ;;  %p28_p8 = scmp.ge.s32.totalorder %s1559_s24, 4   ;;  %s1796_s29 = smov %s1311_s30 }
 0x2fe   : > { %s1797_s30 = smov %s1315_s9  ;;  %s1798_s9 = smov %s1571_s7 }
 0x2ff   : > { %s1799_s10 = smov %s1559_s24  ;;  %30 = sbr.rel (!%p28_p8) target bundleno = 14 (0xe), region = 130 }
 0x306   :  { %740 = vsyncpa [#allocation4], 1 }
 0x307   :  { %742 = vsyncpa [#allocation4 + $0x1], 1 }
 0x308   :  { %743 = vsyncpa [#allocation7], 1 }
 0x309   :  { %745 = vsyncpa [#allocation7 + $0x1], 1 }
 0x30a   :  { %746 = vsyncpa [#allocation10], 1 }
 0x30b   :  { %747 = vsyncpa [#allocation13], 1 }
 0x30c   :  { %748 = vsyncpa [#allocation5], 1 }
 0x30d   :  { %750 = vsyncpa [#allocation5 + $0x1], 1 }

</bundles_post_ra>
